<compile_context>
chip_gen: v5e
topology: v5e:2x2
jax: 0.10.0
libtpu: 0.0.40
codegen_flags: <defaults>
</compile_context>

<pallas_src>
import functools

import jax
import jax.numpy as jnp
from jax import lax
from jax.experimental import pallas as pl

# ----------------------------- configuration --------------------------------
B = 2
IN_CHANNELS = 16
CHANNELS = 16
KERNEL = 3
STRIDE = 1
PADDING = 1
GROUPS = 2
RADIX = 2
REDUCTION = 4
H = W = 8
INTER = max(32, IN_CHANNELS * RADIX // REDUCTION)
BN_EPS = 1e-5


# ------------------------------- kernel --------------------------------------
def _fused_split_attention_kernel(patches_ref, wc_ref, b1_ref, w1_ref, b2_ref,
                                  w2sel_ref, psel_ref, bmask_ref, o_ref,
                                  *, C, R):
    """Fused split-attention forward.  Batch is folded into lanes (L = B*HW).

    patches_ref: (Cin*K*K, L)   im2col patches, lane-dense
    wc_ref:      (C*R, Cin*K*K) block-diag grouped conv weight * BN1 scale
    b1_ref:      (C*R, 1)       conv bias * BN1 scale + BN1 shift
    w1_ref:      (INTER, C)     block-diag grouped 1x1 weight * BN2 scale
    b2_ref:      (INTER, 1)     BN2 shift
    w2sel_ref:   (Rpad, INTER)  rows {r*Cg} (g=0, cg=0) of 2nd 1x1 weight
    psel_ref:    (R*C, L)       static 0/1: [row, l] = (l % HW == row)
    bmask_ref:   (L, L)         static 0/1: [l', l] = (l'//HW == l//HW)
    o_ref:       (C, L)
    """
    # grouped conv (block-diag matmul) + folded BN + ReLU
    y = jnp.maximum(
        jnp.dot(wc_ref[...], patches_ref[...],
                preferred_element_type=jnp.float32) + b1_ref[...], 0.0)

    # gap = sum over the radix channel splits
    gap = y[0:C, :]
    for r in range(1, R):
        gap = gap + y[r * C:(r + 1) * C, :]

    # attention: grouped 1x1 -> BN -> ReLU -> (selected rows of) grouped 1x1
    a1 = jnp.maximum(
        jnp.dot(w1_ref[...], gap, preferred_element_type=jnp.float32)
        + b2_ref[...], 0.0)
    a2s = jnp.dot(w2sel_ref[...], a1, preferred_element_type=jnp.float32)

    # radix softmax at (g=0, cg=0); the module only ever consumes the r=0
    # component (truncating split/zip), evaluated at spatial positions r*C+c.
    m = a2s[0:1, :]
    for r in range(1, R):
        m = jnp.maximum(m, a2s[r:r + 1, :])
    exps = [jnp.exp(a2s[r:r + 1, :] - m) for r in range(R)]
    den = exps[0]
    for r in range(1, R):
        den = den + exps[r]
    sm0 = exps[0] * pl.reciprocal(den, approx=True)          # (1, L)

    # lane -> sublane transpose of sm0 via iota mask + lane reduce (XLU)
    L = sm0.shape[1]
    rid = lax.broadcasted_iota(jnp.int32, (L, L), 0)
    cid = lax.broadcasted_iota(jnp.int32, (L, L), 1)
    diag = jnp.where(rid == cid, jnp.broadcast_to(sm0, (L, L)), 0.0)
    sm_col = jnp.sum(diag, axis=1, keepdims=True)            # (L, 1)

    # att[r*C + c, b*HW + s] = sm0[b*HW + r*C + c]
    # (static row selection + per-batch lane-block broadcast via one matmul)
    att = jnp.dot(psel_ref[...], sm_col * bmask_ref[...],
                  preferred_element_type=jnp.float32)        # (R*C, L)

    # radix-weighted combine
    prod = att * y
    out = prod[0:C, :]
    for r in range(1, R):
        out = out + prod[r * C:(r + 1) * C, :]
    o_ref[...] = out


# ------------------------------- JAX glue ------------------------------------
def _im2col(x, k, stride, padding):
    """NCHW -> (B, Cin*k*k, Ho*Wo) patches, row order (cin, kh, kw)."""
    Bn, Cin, Hin, Win = x.shape
    xp = jnp.pad(x, ((0, 0), (0, 0), (padding, padding), (padding, padding)))
    Ho = (Hin + 2 * padding - k) // stride + 1
    Wo = (Win + 2 * padding - k) // stride + 1
    cols = []
    for kh in range(k):
        for kw in range(k):
            patch = lax.slice(
                xp,
                (0, 0, kh, kw),
                (Bn, Cin, kh + (Ho - 1) * stride + 1, kw + (Wo - 1) * stride + 1),
                (1, 1, stride, stride))
            cols.append(patch.reshape(Bn, Cin, Ho * Wo))
    cols = jnp.stack(cols, axis=2)                    # (B, Cin, k*k, Ho*Wo)
    return cols.reshape(Bn, Cin * k * k, Ho * Wo), Ho, Wo


def _block_diag(w, n_groups):
    """Grouped weight (O, I_per_group) -> block-diagonal (O, I_per_group*groups)."""
    O, Ipg = w.shape
    Opg = O // n_groups
    out = jnp.zeros((O, Ipg * n_groups), w.dtype)
    for g in range(n_groups):
        out = out.at[g * Opg:(g + 1) * Opg, g * Ipg:(g + 1) * Ipg].set(
            w[g * Opg:(g + 1) * Opg])
    return out


def split_attention_forward(x, p):
    Bn, Cin, _, _ = x.shape
    C, R, G, K = CHANNELS, RADIX, GROUPS, KERNEL

    patches, Ho, Wo = _im2col(x, K, STRIDE, PADDING)   # (B, Cin*K*K, HW)
    HW = Ho * Wo
    L = Bn * HW
    D1 = Cin * K * K
    # Truncated-attention flattening assumption (first R*C flattened softmax
    # entries all come from the g=0, cg=0 channel, spatial 0..R*C-1).
    assert R * C <= HW, "split-attention truncation requires radix*channels <= H*W"

    # fold batch into the lane axis -> lane-dense (D1, B*HW)
    patches2 = jnp.transpose(patches, (1, 0, 2)).reshape(D1, L)

    # block-diagonal grouped weights, BN (inference) folded into the weights
    wc = _block_diag(p["wconv"].reshape(C * R, -1), G * R) * p["scale1"][:, None]
    b1 = (p["bconv"] * p["scale1"] + p["shift1"]).reshape(C * R, 1)
    w1 = _block_diag(p["w1"].reshape(INTER, -1), G) * p["scale2"][:, None]
    b2 = p["shift2"].reshape(INTER, 1)

    # only the a2 rows consumed by the truncated RSoftMax: cardinal-major
    # channels o = r*Cg (g=0, cg=0); pad to a multiple of 8 sublanes.
    Cg = C // G
    w2_bd = _block_diag(p["w2"].reshape(C * R, -1), G)          # (C*R, INTER)
    w2sel = jnp.stack([w2_bd[r * Cg] for r in range(R)], axis=0)
    rpad = ((R + 7) // 8) * 8
    w2sel = jnp.pad(w2sel, ((0, rpad - R), (0, 0)))             # (rpad, INTER)

    # static selection / batch-block-broadcast constants for the in-kernel
    # attention gather (replaces the host reshape/transpose + 2nd kernel)
    lane = jnp.arange(L, dtype=jnp.int32)
    row_ids = jnp.arange(R * C, dtype=jnp.int32)[:, None]
    psel = (lane[None, :] % HW == row_ids).astype(jnp.float32)  # (R*C, L)
    blk = lane // HW
    bmask = (blk[:, None] == blk[None, :]).astype(jnp.float32)  # (L, L)

    out2 = pl.pallas_call(
        functools.partial(_fused_split_attention_kernel, C=C, R=R),
        out_shape=jax.ShapeDtypeStruct((C, L), jnp.float32),
    )(patches2, wc, b1, w1, b2, w2sel, psel, bmask)

    return jnp.transpose(out2.reshape(C, Bn, HW), (1, 0, 2)).reshape(Bn, C, Ho, Wo)


# -------------------------- params & pure-JAX reference ----------------------
def make_params(key):
    ks = jax.random.split(key, 12)
    cin_pg = IN_CHANNELS // (GROUPS * RADIX)
    p = {}
    p["wconv"] = 0.1 * jax.random.normal(
        ks[0], (CHANNELS * RADIX, cin_pg, KERNEL, KERNEL), jnp.float32)
    p["bconv"] = 0.1 * jax.random.normal(ks[1], (CHANNELS * RADIX,), jnp.float32)
    g1 = 1.0 + 0.1 * jax.random.normal(ks[2], (CHANNELS * RADIX,), jnp.float32)
    bt1 = 0.1 * jax.random.normal(ks[3], (CHANNELS * RADIX,), jnp.float32)
    m1 = 0.05 * jax.random.normal(ks[4], (CHANNELS * RADIX,), jnp.float32)
    v1 = jax.random.uniform(ks[5], (CHANNELS * RADIX,), jnp.float32, 0.5, 1.5)
    p["scale1"] = g1 * lax.rsqrt(v1 + BN_EPS)
    p["shift1"] = bt1 - m1 * p["scale1"]
    p["w1"] = 0.1 * jax.random.normal(
        ks[6], (INTER, CHANNELS // GROUPS, 1, 1), jnp.float32)
    g2 = 1.0 + 0.1 * jax.random.normal(ks[7], (INTER,), jnp.float32)
    bt2 = 0.1 * jax.random.normal(ks[8], (INTER,), jnp.float32)
    m2 = 0.05 * jax.random.normal(ks[9], (INTER,), jnp.float32)
    v2 = jax.random.uniform(ks[10], (INTER,), jnp.float32, 0.5, 1.5)
    p["scale2"] = g2 * lax.rsqrt(v2 + BN_EPS)
    p["shift2"] = bt2 - m2 * p["scale2"]
    p["w2"] = 0.1 * jax.random.normal(
        ks[11], (CHANNELS * RADIX, INTER // GROUPS, 1, 1), jnp.float32)
    return p


def reference_forward(x, p):
    """Pure-JAX mirror of the PyTorch forward (inference-mode BN)."""
    dn = ("NCHW", "OIHW", "NCHW")
    conv = lax.conv_general_dilated(
        x, p["wconv"], (STRIDE, STRIDE), [(PADDING, PADDING), (PADDING, PADDING)],
        dimension_numbers=dn, feature_group_count=GROUPS * RADIX,
        precision=lax.Precision.HIGHEST)
    conv = conv + p["bconv"][None, :, None, None]
    y = jnp.maximum(conv * p["scale1"][None, :, None, None]
                    + p["shift1"][None, :, None, None], 0.0)
    Bn, rC, Ho, Wo = y.shape
    C = rC // RADIX
    gap = y.reshape(Bn, RADIX, C, Ho, Wo).sum(axis=1)
    a1 = lax.conv_general_dilated(
        gap, p["w1"], (1, 1), "VALID", dimension_numbers=dn,
        feature_group_count=GROUPS, precision=lax.Precision.HIGHEST)
    a1 = jnp.maximum(a1 * p["scale2"][None, :, None, None]
                     + p["shift2"][None, :, None, None], 0.0)
    a2 = lax.conv_general_dilated(
        a1, p["w2"], (1, 1), "VALID", dimension_numbers=dn,
        feature_group_count=GROUPS, precision=lax.Precision.HIGHEST)
    # RSoftMax: view(B, G, R, -1).transpose(1,2); softmax over radix; flatten
    t = a2.reshape(Bn, GROUPS, RADIX, -1)
    t = jax.nn.softmax(t, axis=2)
    t = jnp.transpose(t, (0, 2, 1, 3)).reshape(Bn, -1)
    att = t[:, :RADIX * C].reshape(Bn, RADIX, C, 1, 1)
    out = (att * y.reshape(Bn, RADIX, C, Ho, Wo)).sum(axis=1)
    return out


# --------------------------------- main ---------------------------------------
if __name__ == "__main__":
    key = jax.random.PRNGKey(0)
    kx, kp = jax.random.split(key)
    x = jax.random.normal(kx, (B, IN_CHANNELS, H, W), jnp.float32)
    params = make_params(kp)

    out = split_attention_forward(x, params)
    out = jax.block_until_ready(out)

    ref = reference_forward(x, params)
    assert out.shape == (B, CHANNELS, H, W)
    assert bool(jnp.allclose(out, ref, atol=1e-2, rtol=1e-2))
    print("KERNEL_OK")
</pallas_src>

<mosaic_0001>
module attributes {stable_mosaic.version = 11 : i64} {
  func.func @_fused_split_attention_kernel(%arg0: memref<144x128xf32, #tpu.memory_space<vmem>>, %arg1: memref<32x144xf32, #tpu.memory_space<vmem>>, %arg2: memref<32x1xf32, #tpu.memory_space<vmem>>, %arg3: memref<32x16xf32, #tpu.memory_space<vmem>>, %arg4: memref<32x1xf32, #tpu.memory_space<vmem>>, %arg5: memref<8x32xf32, #tpu.memory_space<vmem>>, %arg6: memref<32x128xf32, #tpu.memory_space<vmem>>, %arg7: memref<128x128xf32, #tpu.memory_space<vmem>>, %arg8: memref<16x128xf32, #tpu.memory_space<vmem>>) attributes {dimension_semantics = [], scalar_prefetch = 0 : i64, scratch_operands = 0 : i64, tpu.core_type = #tpu.core_type<tc>} {
    %c0 = arith.constant 0 : index
    %c0_0 = arith.constant 0 : index
    %0 = vector.load %arg1[%c0, %c0_0] : memref<32x144xf32, #tpu.memory_space<vmem>>, vector<32x144xf32>
    %c0_1 = arith.constant 0 : index
    %c0_2 = arith.constant 0 : index
    %1 = vector.load %arg0[%c0_1, %c0_2] : memref<144x128xf32, #tpu.memory_space<vmem>>, vector<144x128xf32>
    %cst = arith.constant dense<0.000000e+00> : vector<32x128xf32>
    %2 = tpu.matmul %0, %1, %cst {dimension_numbers = #tpu.dot_dimension_numbers<[1], [0], [0], [1], [0, 0, 1, 1], [], []>} : vector<32x144xf32>, vector<144x128xf32>, vector<32x128xf32> -> vector<32x128xf32>
    %c0_3 = arith.constant 0 : index
    %c0_4 = arith.constant 0 : index
    %3 = vector.load %arg2[%c0_3, %c0_4] : memref<32x1xf32, #tpu.memory_space<vmem>>, vector<32x1xf32>
    %4 = vector.broadcast %3 : vector<32x1xf32> to vector<32x128xf32>
    %5 = arith.addf %2, %4 : vector<32x128xf32>
    %cst_5 = arith.constant 0.000000e+00 : f32
    %6 = vector.broadcast %cst_5 : f32 to vector<32x128xf32>
    %7 = arith.maximumf %5, %6 : vector<32x128xf32>
    %8 = vector.extract_strided_slice %7 {offsets = [0, 0], sizes = [16, 128], strides = [1, 1]} : vector<32x128xf32> to vector<16x128xf32>
    %9 = vector.extract_strided_slice %7 {offsets = [16, 0], sizes = [16, 128], strides = [1, 1]} : vector<32x128xf32> to vector<16x128xf32>
    %10 = arith.addf %8, %9 : vector<16x128xf32>
    %c0_6 = arith.constant 0 : index
    %c0_7 = arith.constant 0 : index
    %11 = vector.load %arg3[%c0_6, %c0_7] : memref<32x16xf32, #tpu.memory_space<vmem>>, vector<32x16xf32>
    %cst_8 = arith.constant dense<0.000000e+00> : vector<32x128xf32>
    %12 = tpu.matmul %11, %10, %cst_8 {dimension_numbers = #tpu.dot_dimension_numbers<[1], [0], [0], [1], [0, 0, 1, 1], [], []>} : vector<32x16xf32>, vector<16x128xf32>, vector<32x128xf32> -> vector<32x128xf32>
    %c0_9 = arith.constant 0 : index
    %c0_10 = arith.constant 0 : index
    %13 = vector.load %arg4[%c0_9, %c0_10] : memref<32x1xf32, #tpu.memory_space<vmem>>, vector<32x1xf32>
    %14 = vector.broadcast %13 : vector<32x1xf32> to vector<32x128xf32>
    %15 = arith.addf %12, %14 : vector<32x128xf32>
    %cst_11 = arith.constant 0.000000e+00 : f32
    %16 = vector.broadcast %cst_11 : f32 to vector<32x128xf32>
    %17 = arith.maximumf %15, %16 : vector<32x128xf32>
    %c0_12 = arith.constant 0 : index
    %c0_13 = arith.constant 0 : index
    %18 = vector.load %arg5[%c0_12, %c0_13] : memref<8x32xf32, #tpu.memory_space<vmem>>, vector<8x32xf32>
    %cst_14 = arith.constant dense<0.000000e+00> : vector<8x128xf32>
    %19 = tpu.matmul %18, %17, %cst_14 {dimension_numbers = #tpu.dot_dimension_numbers<[1], [0], [0], [1], [0, 0, 1, 1], [], []>} : vector<8x32xf32>, vector<32x128xf32>, vector<8x128xf32> -> vector<8x128xf32>
    %20 = vector.extract_strided_slice %19 {offsets = [0, 0], sizes = [1, 128], strides = [1, 1]} : vector<8x128xf32> to vector<1x128xf32>
    %21 = vector.extract_strided_slice %19 {offsets = [1, 0], sizes = [1, 128], strides = [1, 1]} : vector<8x128xf32> to vector<1x128xf32>
    %22 = arith.maximumf %20, %21 : vector<1x128xf32>
    %23 = vector.extract_strided_slice %19 {offsets = [0, 0], sizes = [1, 128], strides = [1, 1]} : vector<8x128xf32> to vector<1x128xf32>
    %24 = arith.subf %23, %22 : vector<1x128xf32>
    %25 = math.exp %24 : vector<1x128xf32>
    %26 = vector.extract_strided_slice %19 {offsets = [1, 0], sizes = [1, 128], strides = [1, 1]} : vector<8x128xf32> to vector<1x128xf32>
    %27 = arith.subf %26, %22 : vector<1x128xf32>
    %28 = math.exp %27 : vector<1x128xf32>
    %29 = arith.addf %25, %28 : vector<1x128xf32>
    %30 = tpu.reciprocal %29 {approx = true} : vector<1x128xf32> -> vector<1x128xf32>
    %31 = arith.mulf %25, %30 : vector<1x128xf32>
    %32 = tpu.iota {dimensions = array<i32: 0>} : vector<128x128xi32>
    %33 = tpu.iota {dimensions = array<i32: 1>} : vector<128x128xi32>
    %34 = arith.cmpi eq, %32, %33 : vector<128x128xi32>
    %35 = vector.shape_cast %31 : vector<1x128xf32> to vector<1x128xf32>
    %36 = vector.broadcast %35 : vector<1x128xf32> to vector<128x128xf32>
    %cst_15 = arith.constant 0.000000e+00 : f32
    %37 = vector.broadcast %cst_15 : f32 to vector<128x128xf32>
    %38 = arith.select %34, %36, %37 : vector<128x128xi1>, vector<128x128xf32>
    %cst_16 = arith.constant dense<0.000000e+00> : vector<128xf32>
    %39 = vector.multi_reduction <add>, %38, %cst_16 [1] : vector<128x128xf32> to vector<128xf32>
    %40 = vector.shape_cast %39 : vector<128xf32> to vector<128x1xf32>
    %c0_17 = arith.constant 0 : index
    %c0_18 = arith.constant 0 : index
    %41 = vector.load %arg6[%c0_17, %c0_18] : memref<32x128xf32, #tpu.memory_space<vmem>>, vector<32x128xf32>
    %c0_19 = arith.constant 0 : index
    %c0_20 = arith.constant 0 : index
    %42 = vector.load %arg7[%c0_19, %c0_20] : memref<128x128xf32, #tpu.memory_space<vmem>>, vector<128x128xf32>
    %43 = vector.broadcast %40 : vector<128x1xf32> to vector<128x128xf32>
    %44 = arith.mulf %43, %42 : vector<128x128xf32>
    %cst_21 = arith.constant dense<0.000000e+00> : vector<32x128xf32>
    %45 = tpu.matmul %41, %44, %cst_21 {dimension_numbers = #tpu.dot_dimension_numbers<[1], [0], [0], [1], [0, 0, 1, 1], [], []>} : vector<32x128xf32>, vector<128x128xf32>, vector<32x128xf32> -> vector<32x128xf32>
    %46 = arith.mulf %45, %7 : vector<32x128xf32>
    %47 = vector.extract_strided_slice %46 {offsets = [0, 0], sizes = [16, 128], strides = [1, 1]} : vector<32x128xf32> to vector<16x128xf32>
    %48 = vector.extract_strided_slice %46 {offsets = [16, 0], sizes = [16, 128], strides = [1, 1]} : vector<32x128xf32> to vector<16x128xf32>
    %49 = arith.addf %47, %48 : vector<16x128xf32>
    %c0_22 = arith.constant 0 : index
    %c0_23 = arith.constant 0 : index
    %50 = vector.load %arg8[%c0_22, %c0_23] : memref<16x128xf32, #tpu.memory_space<vmem>>, vector<16x128xf32>
    tpu.vector_store %arg8[%c0_22, %c0_23], %49 {strides = array<i32>} : memref<16x128xf32, #tpu.memory_space<vmem>>, vector<16x128xf32>,
    return
  }
}

</mosaic_0001>

<bundles_post_ra>
// kernel: tpu_custom_call.1
= control target key start
LH: loop header
LB: loop body
LE: loop exit
PB: predicated region body
PF: predicated region fallthrough
CT: control target
= control target key end

     0   :  { %13 = vsyncpa [#allocation3], 0  ;;  %s856_s0 = inlined_call_operand.hbm [shape: f32[144,128], index: 0, kind: input, shape index: {}]   ;;  %s857_s1 = inlined_call_operand.vmem [shape: f32[32,144], index: 1, kind: input, shape index: {}]   ;;  %s858_s2 = inlined_call_operand.vmem [shape: f32[32,1], index: 2, kind: input, shape index: {}]   ;;  %s859_s3 = inlined_call_operand.vmem [shape: f32[32,16], index: 3, kind: input, shape index: {}]   ;;  %s860_s4 = inlined_call_operand.vmem [shape: f32[32,1], index: 4, kind: input, shape index: {}]   ;;  %s861_s5 = inlined_call_operand.hbm [shape: f32[8,32], index: 5, kind: input, shape index: {}]   ;;  %s862_s6 = inlined_call_operand.vmem [shape: f32[32,128], index: 6, kind: input, shape index: {}]   ;;  %s863_s7 = inlined_call_operand.hbm [shape: f32[128,128], index: 7, kind: input, shape index: {}]   ;;  %s864_s8 = inlined_call_operand.hbm [shape: f32[16,128], index: 8, kind: output, shape index: {}]  }
   0x1   :  { %14 = vsyncpa [#allocation6], 0  ;;  %s42_s29 = sshll.u32 %s861_s5, 4  ;;  %s43_s29 = int_to_ptr.hbm [resolvable:$true] %s42_s29 }
   0x2   :  { %15 = vsyncpa [#allocation4], 0  ;;  %s639_s30 = smov [#allocation5]   ;;  %s20_s12 = sshll.u32 %s856_s0, 4  ;;  %s21_s12 = int_to_ptr.hbm [resolvable:$true] %s20_s12 }
   0x3   :  { %s44_s9 = sshll.u32 %s639_s30, 4  ;;  %s640_s13 = smov [#allocation2]   ;;  %s45_s9 = int_to_ptr.vmem [resolvable:$true] %s44_s9 }
   0x4   :  { %47 = dma.hbm_to_vmem [thread:$0]  %s43_s29, 128, %s45_s9, [#allocation6]  }
   0x5   :  { %s22_s14 = sshll.u32 %s640_s13, 4  ;;  %s641_s15 = smov 128   ;;  %s23_s14 = int_to_ptr.vmem [resolvable:$true] %s22_s14 }
   0x6   :  { %s642_s16 = smov 8   ;;  %s54_s18 = sshll.u32 %s863_s7, 4  ;;  %s55_s18 = int_to_ptr.hbm [resolvable:$true] %s54_s18 }
   0x7   :  { %28 = dma.hbm_to_vmem [thread:$0]  %s21_s12, 2304, %s23_s14, [#allocation3], %s641_s15, %s641_s15, %s642_s16  }
   0x8   :  { %s643_s19 = smov [#allocation7]  }
   0x9   :  { %s56_s20 = sshll.u32 %s643_s19, 4  ;;  %s57_s20 = int_to_ptr.vmem [resolvable:$true] %s56_s20 }
   0xa   :  { %62 = dma.hbm_to_vmem [thread:$0]  %s55_s18, 2048, %s57_s20, [#allocation6], %s641_s15, %s641_s15, %s642_s16  }
   0xb   :  { %633 = dma.done.wait [#allocation3], 2304  }
   0xc   :  { %634 = vsyncadd [#allocation3], 4294964992 }
   0xd   :  { %635 = dma.done.wait [#allocation6], 2176  }
   0xe   :  { %636 = vsyncadd [#allocation6], 4294965120  ;;  %v98_v0 = vld [vmem:[#allocation2 + $0x78] sm:$0xff]  ;;  %v97_v1 = vld [vmem:[#allocation2 + $0x70] sm:$0xff]  ;;  %vm125_vm0 = vcmask 130048   ;;  %v644_v12 = vmov 0  }
   0xf   :  { %138 = vmatpush.msra.mxu0 %v98_v0  ;;  %v96_v2 = vld [vmem:[#allocation2 + $0x68] sm:$0xff]  ;;  %v95_v3 = vld [vmem:[#allocation2 + $0x60] sm:$0xff]  ;;  %v94_v5 = vld [vmem:[#allocation2 + $0x58] sm:$0xff]  ;;  %529 = vset.pattern.permute.xlu1 %v644_v12  ;;  %vm276_vm1 = vcmask 261120   ;;  %s645_s18 = smov [#allocation8]  }
  0x10   :  { %v100_v4 = vld [vmem:[#allocation2 + $0x88] sm:$0xff]  ;;  %v99_v6 = vld [vmem:[#allocation2 + $0x80] sm:$0xff]  ;;  %v93_v8 = vld [vmem:[#allocation2 + $0x50] sm:$0xff]  ;;  %528 = vset.pattern.permute.xlu0 %v644_v12  ;;  %530 = vset.pattern.permute.xlu2 %v644_v12  ;;  %s480_s19 = sshll.u32 %s645_s18, 4  ;;  %s481_s19 = int_to_ptr.vmem [resolvable:$true] %s480_s19 }
  0x11   :  { %139 = vmatpush.msra.mxu0 %v97_v1  ;;  %181 = vmatpush.msra.mxu1 %v100_v4  ;;  %v76_v7 = vld [vmem:[%s857_s1 + $0x8] sm:$0xff]  ;;  %v101_v10 = vld [vmem:[%s858_s2] sm:$0xff]  ;;  %v90_v14 = vld [vmem:[#allocation2 + $0x38] sm:$0xff] }
  0x12   :  { %v102_v9 = vld [vmem:[%s858_s2 + $0x8] sm:$0xff]  ;;  %v91_v13 = vld [vmem:[#allocation2 + $0x40] sm:$0xff]  ;;  %107 = vperm.xlu1 %529, %v101_v10   ;;  %v78_v15 = vld [vmem:[%s857_s1 + $0x18] sm:$0xff] }
  0x13   :  { %140 = vmatpush.msra.mxu0 %v96_v2  ;;  %182 = vmatpush.msra.mxu1 %v99_v6  ;;  %v92_v11 = vld [vmem:[#allocation2 + $0x48] sm:$0xff]  ;;  %v89_v16 = vld [vmem:[#allocation2 + $0x30] sm:$0xff]  ;;  %v104_v17 = vld [vmem:[%s858_s2 + $0x18] sm:$0xff] }
  0x14   :  { %496 = vmatmul.msk.f32.vlgmr.msra.gmra.mxu1 %vm125_vm0, %v76_v7  ;;  %112 = vperm.xlu0 %528, %v102_v9   ;;  %v103_v18 = vld [vmem:[%s858_s2 + $0x10] sm:$0xff]  ;;  %v88_v19 = vld [vmem:[#allocation2 + $0x28] sm:$0xff]  ;;  %v87_v20 = vld [vmem:[#allocation2 + $0x20] sm:$0xff] }
  0x15   :  { %141 = vmatpush.msra.mxu0 %v95_v3  ;;  %v86_v21 = vld [vmem:[#allocation2 + $0x18] sm:$0xff]  ;;  %v80_v22 = vld [vmem:[%s857_s1 + $0x28] sm:$0xff]  ;;  %v85_v23 = vld [vmem:[#allocation2 + $0x10] sm:$0xff] }
  0x16   :  { %v207_v24 = vld [vmem:[%s860_s4 + $0x8] sm:$0xff]  ;;  %v206_v25 = vld [vmem:[%s860_s4] sm:$0xff]  ;;  %v82_v29 = vld [vmem:[%s857_s1 + $0x38] sm:$0xff] }
  0x17   :  { %142 = vmatpush.msra.mxu0 %v94_v5  ;;  %v84_v26 = vld [vmem:[#allocation2 + $0x8] sm:$0xff]  ;;  %v83_v27 = vld [vmem:[#allocation2] sm:$0xff]  ;;  %v77_v30 = vld [vmem:[%s857_s1 + $0x10] sm:$0xff] }
  0x18   :  { %v75_v28 = vld [vmem:[%s857_s1] sm:$0xff]  ;;  %v81_v32 = vld [vmem:[%s857_s1 + $0x30] sm:$0xff]  ;;  %v209_v53 = vld [vmem:[%s860_s4 + $0x18] sm:$0xff] }
  0x19   :  { %143 = vmatpush.msra.mxu0 %v93_v8  ;;  %v79_v31 = vld [vmem:[%s857_s1 + $0x20] sm:$0xff]  ;;  %227 = vperm.xlu2 %530, %v209_v53   ;;  %v208_v61 = vld [vmem:[%s860_s4 + $0x10] sm:$0xff]  ;;  %v203_v62 = vld [vmem:[%s859_s3 + $0x8] sm:$0xff] }
  0x1a   :  { %117 = vperm.xlu1 %529, %v103_v18   ;;  %v202_v60 = vld [vmem:[%s859_s3] sm:$0xff]  ;;  %v204_v63 = vld [vmem:[%s859_s3 + $0x10] sm:$0xff]  ;;  %v205_v0 = vld [vmem:[%s859_s3 + $0x18] sm:$0xff] }
  0x1b   :  { %144 = vmatpush.msra.mxu0 %v92_v11 }
  0x1c   :  { %497 = vmatmul.msk.f32.gmra.mxu1 %vm125_vm0, %v78_v15  ;;  %122 = vperm.xlu0 %528, %v104_v17   ;;  %v275_v17 = vld [vmem:[#allocation5] sm:$0xff] }
  0x1d   :  { %145 = vmatpush.msra.mxu0 %v91_v13 }
  0x1f   :  { %146 = vmatpush.msra.mxu0 %v90_v14 }
  0x21   :  { %147 = vmatpush.msra.mxu0 %v89_v16  ;;  %222 = vperm.xlu2 %530, %v208_v61  }
  0x22   :  { %212 = vperm.xlu1 %529, %v206_v25  }
  0x23   :  { %148 = vmatpush.msra.mxu0 %v88_v19 }
  0x24   :  { %498 = vmatmul.msk.f32.gmra.mxu1 %vm125_vm0, %v80_v22  ;;  %217 = vperm.xlu0 %528, %v207_v24  }
  0x25   :  { %149 = vmatpush.msra.mxu0 %v87_v20 }
  0x27   :  { %150 = vmatpush.msra.mxu0 %v86_v21 }
  0x29   :  { %151 = vmatpush.msra.mxu0 %v85_v23 }
  0x2b   :  { %152 = vmatpush.msra.mxu0 %v84_v26 }
  0x2c   :  { %499 = vmatmul.msk.f32.gmra.mxu1 %vm125_vm0, %v82_v29 }
  0x2d   :  { %153 = vmatpush.msra.mxu0 %v83_v27 }
  0x2e   :  { %154 = vmatmul.f32.vlgmr.msra.gmra.mxu0 %v75_v28  ;;  %v319_v28 = vlaneseq }
  0x36   :  { %157 = vmatmul.f32.gmra.mxu0 %v77_v30 }
  0x3e   :  { %160 = vmatmul.f32.gmra.mxu0 %v79_v31  ;;  %v794_v31 = vshrl.u32 %v319_v28, 7 }
  0x40   :  { %v327_v53 = vadd.s32 56, %v794_v31 }
  0x46   :  { %163 = vmatmul.f32.gmra.mxu0 %v81_v32  ;;  %v335_v32 = vadd.s32 120, %v794_v31 }
  0x73   :  { %v228_v3 = vpop.permute.xlu2 %227 }
  0x7b   :  { %v223_v5 = vpop.permute.xlu2 %222 }
  0x84   :  { %v108_v37 = vpop.permute.xlu1 %107 }
  0x86   :  { %v113_v38 = vpop.permute.xlu0 %112 }
  0x8c   :  { %v118_v41 = vpop.permute.xlu1 %117 }
  0x8e   :  { %v123_v45 = vpop.permute.xlu0 %122 }
  0x91   :  { %v184_v33 = vpop.f32.mrf.mxu1 }
  0x94   :  { %v213_v12 = vpop.permute.xlu1 %212 }
  0x96   :  { %v218_v9 = vpop.permute.xlu0 %217 }
  0x99   :  { %v187_v35 = vpop.f32.mrf.mxu1 }
  0xa1   :  { %v190_v39 = vpop.f32.mrf.mxu1 }
  0xa9   :  { %v193_v47 = vpop.f32.mrf.mxu1 }
  0xab   :  { %v155_v34 = vpop.f32.mrf.mxu0 }
  0xac   :  { %v156_v44 = vadd.f32 %v155_v34, %v108_v37  ;;  %v334_v34 = vadd.s32 112, %v794_v31 }
  0xae   :  { %v756_v51 = vadd.f32 %v184_v33, %v156_v44  ;;  %v797_v33 = vand.u32 127, %v319_v28  ;;  %v329_v44 = vadd.s32 72, %v794_v31 }
  0xb0   :  { %v196_v57 = vmax.f32 %v756_v51, 0.0  ;;  %vm353_vm2 = vcmp.eq.s32.totalorder %v335_v32, %v797_v33  ;;  %vm352_vm3 = vcmp.eq.s32.totalorder %v334_v34, %v797_v33  ;;  %vm347_vm7 = vcmp.eq.s32.totalorder %v329_v44, %v797_v33  ;;  %v415_v34 = vld [vmem:[#allocation7 + $0x40] sm:$0xff] }
  0xb1   :  { %vm345_vm9 = vcmp.eq.s32.totalorder %v327_v53, %v797_v33 }
  0xb3   :  { %v158_v36 = vpop.f32.mrf.mxu0 }
  0xb4   :  { %v159_v42 = vadd.f32 %v158_v36, %v113_v38 }
  0xb6   :  { %v752_v48 = vadd.f32 %v187_v35, %v159_v42  ;;  %v333_v35 = vadd.s32 104, %v794_v31  ;;  %v332_v42 = vadd.s32 96, %v794_v31 }
  0xb8   :  { %v197_v54 = vmax.f32 %v752_v48, 0.0  ;;  %vm351_vm4 = vcmp.eq.s32.totalorder %v333_v35, %v797_v33  ;;  %vm350_vm5 = vcmp.eq.s32.totalorder %v332_v42, %v797_v33  ;;  %v414_v35 = vld [vmem:[#allocation7 + $0x38] sm:$0xff]  ;;  %v412_v42 = vld [vmem:[#allocation7 + $0x28] sm:$0xff] }
  0xbb   :  { %v161_v40 = vpop.f32.mrf.mxu0 }
  0xbc   :  { %v162_v43 = vadd.f32 %v161_v40, %v118_v41 }
  0xbe   :  { %v754_v49 = vadd.f32 %v190_v39, %v162_v43  ;;  %v330_v43 = vadd.s32 80, %v794_v31 }
  0xc0   :  { %v198_v55 = vmax.f32 %v754_v49, 0.0  ;;  %vm348_vm6 = vcmp.eq.s32.totalorder %v330_v43, %v797_v33  ;;  %v411_v43 = vld [vmem:[#allocation7 + $0x20] sm:$0xff] }
  0xc2   :  { %v200_v59 = vadd.f32 %v198_v55, %v196_v57 }
  0xc3   :  { %v164_v46 = vpop.f32.mrf.mxu0 }
  0xc4   :  { %v165_v50 = vadd.f32 %v164_v46, %v123_v45 }
  0xc6   :  { %v758_v52 = vadd.f32 %v193_v47, %v165_v50  ;;  %v331_v50 = vadd.s32 88, %v794_v31 }
  0xc8   :  { %v199_v56 = vmax.f32 %v758_v52, 0.0  ;;  %vm349_vm8 = vcmp.eq.s32.totalorder %v331_v50, %v797_v33 }
  0xca   :  { %v201_v58 = vadd.f32 %v199_v56, %v197_v54 }
  0xcc   :  { %256 = vmatpush.msra.mxu2 %v201_v58  ;;  %v326_v58 = vadd.s32 48, %v794_v31 }
  0xce   :  { %257 = vmatpush.msra.mxu2 %v200_v59  ;;  %vm344_vm10 = vcmp.eq.s32.totalorder %v326_v58, %v797_v33  ;;  %v409_v58 = vld [vmem:[#allocation7 + $0x10] sm:$0xff] }
  0xcf   :  { %500 = vmatmul.msk.f32.vlgmr.msra.gmra.mxu2 %vm125_vm0, %v202_v60 }
  0xd7   :  { %501 = vmatmul.msk.f32.gmra.mxu2 %vm125_vm0, %v203_v62  ;;  %v328_v62 = vadd.s32 64, %v794_v31 }
  0xd9   :  { %vm346_vm11 = vcmp.eq.s32.totalorder %v328_v62, %v797_v33 }
  0xdf   :  { %502 = vmatmul.msk.f32.gmra.mxu2 %vm125_vm0, %v204_v63  ;;  %v324_v63 = vadd.s32 32, %v794_v31 }
  0xe1   :  { %vm342_vm12 = vcmp.eq.s32.totalorder %v324_v63, %v797_v33  ;;  %v407_v63 = vld [vmem:[#allocation7] sm:$0xff] }
  0xe7   :  { %503 = vmatmul.msk.f32.gmra.mxu2 %vm125_vm0, %v205_v0  ;;  %v323_v0 = vadd.s32 24, %v794_v31  ;;  %vm338_vm0 = vcmp.eq.s32.totalorder %v794_v31, %v797_v33 }
  0xe9   :  { %vm341_vm13 = vcmp.eq.s32.totalorder %v323_v0, %v797_v33 }
 0x152   :  { %v259_v1 = vpop.f32.mrf.mxu2 }
 0x153   :  { %v260_v13 = vadd.f32 %v259_v1, %v213_v12 }
 0x155   :  { %v271_v16 = vmax.f32 %v260_v13, 0.0  ;;  %v421_v13 = vld [vmem:[#allocation7 + $0x70] sm:$0xff] }
 0x15a   :  { %v262_v2 = vpop.f32.mrf.mxu2 }
 0x15b   :  { %v263_v10 = vadd.f32 %v262_v2, %v218_v9  ;;  %v322_v9 = vadd.s32 16, %v794_v31 }
 0x15d   :  { %v272_v15 = vmax.f32 %v263_v10, 0.0 }
 0x162   :  { %v265_v4 = vpop.f32.mrf.mxu2 }
 0x163   :  { %v266_v7 = vadd.f32 %v265_v4, %v223_v5  ;;  %v325_v4 = vadd.s32 40, %v794_v31  ;;  %v321_v5 = vadd.s32 8, %v794_v31 }
 0x165   :  { %v273_v14 = vmax.f32 %v266_v7, 0.0  ;;  %vm343_vm14 = vcmp.eq.s32.totalorder %v325_v4, %v797_v33  ;;  %vm339_vm15 = vcmp.eq.s32.totalorder %v321_v5, %v797_v33  ;;  %v405_v4 = vld [vmem:[%s862_s6 + $0x10] sm:$0xff]  ;;  %v404_v5 = vld [vmem:[%s862_s6 + $0x8] sm:$0xff] }
 0x16a   :  { %v268_v6 = vpop.f32.mrf.mxu2 }
 0x16b   :  { %v269_v8 = vadd.f32 %v268_v6, %v228_v3 }
 0x16d   :  { %v274_v11 = vmax.f32 %v269_v8, 0.0 }
 0x16f   :  { %292 = vmatpush.msra.mxu3 %v274_v11  ;;  %v422_v11 = vld [vmem:[#allocation7 + $0x78] sm:$0xff] }
 0x171   :  { %293 = vmatpush.msra.mxu3 %v273_v14 }
 0x173   :  { %294 = vmatpush.msra.mxu3 %v272_v15 }
 0x175   :  { %295 = vmatpush.msra.mxu3 %v271_v16  ;;  %v420_v16 = vld [vmem:[#allocation7 + $0x68] sm:$0xff] }
 0x176   :  { %504 = vmatmul.msk.f32.vlgmr.msra.gmra.mxu3 %vm276_vm1, %v275_v17  ;;  %vm340_vm1 = vcmp.eq.s32.totalorder %v322_v9, %v797_v33 }
 0x1f9   :  { %v297_v18 = vpop.f32.mrf.mxu3 }
 0x1fa   :  { %v301_v19 = vrot.slane %v297_v18, 1 }
 0x1fc   :  { %v303_v20 = vmax.f32 %v297_v18, %v301_v19 }
 0x1fe   :  { %v304_v21 = vsub.f32 %v297_v18, %v303_v20  ;;  %v308_v22 = vrot.slane %v303_v20, 7  ;;  %v419_v20 = vld [vmem:[#allocation7 + $0x60] sm:$0xff] }
 0x200   :  { %v310_v23 = vsub.f32 %v297_v18, %v308_v22  ;;  %v305_v24 = vmul.f32 1.442695, %v304_v21 }
 0x202   :  { %v311_v25 = vmul.f32 1.442695, %v310_v23 }
 0x204   :  { %531 = vpow2.f32 %v311_v25  ;;  %v418_v25 = vld [vmem:[#allocation7 + $0x58] sm:$0xff] }
 0x205   :  { %533 = vpow2.f32 %v305_v24 }
 0x20a   :  { %v532_v26 = vpop.eup %531 }
 0x20b   :  { %v314_v27 = vrot.slane %v532_v26, 1  ;;  %v534_v29 = vpop.eup %533  ;;  %v417_v26 = vld [vmem:[#allocation7 + $0x50] sm:$0xff] }
 0x20d   :  { %v316_v30 = vadd.f32 %v534_v29, %v314_v27 }
 0x20f   :  { %535 = vrcp.f32 %v316_v30 }
 0x215   :  { %v536_v36 = vpop.eup %535 }
 0x216   :  { %v318_v37 = vmul.f32 %v536_v36, %v534_v29  ;;  %v416_v29 = vld [vmem:[#allocation7 + $0x48] sm:$0xff] }
 0x218   :  { %v354_v38 = vperm.slane %v318_v37, 0 }
 0x21a   :  { %v370_v39 = vsel %vm353_vm2, %v354_v38, 0.0  ;;  %v369_v40 = vsel %vm352_vm3, %v354_v38, 0.0  ;;  %v368_v41 = vsel %vm351_vm4, %v354_v38, 0.0  ;;  %v367_v45 = vsel %vm350_vm5, %v354_v38, 0.0 }
 0x21b   :  { %401 = vadd.xlane.f32.xlu2 %v370_v39  ;;  %399 = vadd.xlane.f32.xlu0 %v369_v40  ;;  %v365_v46 = vsel %vm348_vm6, %v354_v38, 0.0  ;;  %v364_v47 = vsel %vm347_vm7, %v354_v38, 0.0  ;;  %v366_v59 = vsel %vm349_vm8, %v354_v38, 0.0  ;;  %v362_v60 = vsel %vm345_vm9, %v354_v38, 0.0 }
 0x21c   :  { %397 = vadd.xlane.f32.xlu1 %v368_v41  ;;  %v361_v61 = vsel %vm344_vm10, %v354_v38, 0.0  ;;  %v363_v1 = vsel %vm346_vm11, %v354_v38, 0.0  ;;  %v359_v2 = vsel %vm342_vm12, %v354_v38, 0.0  ;;  %v358_v3 = vsel %vm341_vm13, %v354_v38, 0.0 }
 0x21d   :  { %v360_v6 = vsel %vm343_vm14, %v354_v38, 0.0  ;;  %v356_v7 = vsel %vm339_vm15, %v354_v38, 0.0  ;;  %v355_v8 = vsel %vm338_vm0, %v354_v38, 0.0  ;;  %v357_v10 = vsel %vm340_vm1, %v354_v38, 0.0  ;;  %v413_v38 = vld [vmem:[#allocation7 + $0x30] sm:$0xff] }
 0x223   :  { %395 = vadd.xlane.f32.xlu2 %v367_v45  ;;  %391 = vadd.xlane.f32.xlu0 %v365_v46 }
 0x224   :  { %389 = vadd.xlane.f32.xlu1 %v364_v47  ;;  %v410_v47 = vld [vmem:[#allocation7 + $0x18] sm:$0xff] }
 0x22b   :  { %393 = vadd.xlane.f32.xlu2 %v366_v59  ;;  %385 = vadd.xlane.f32.xlu0 %v362_v60  ;;  %v408_v59 = vld [vmem:[#allocation7 + $0x8] sm:$0xff] }
 0x22c   :  { %383 = vadd.xlane.f32.xlu1 %v361_v61 }
 0x233   :  { %387 = vadd.xlane.f32.xlu2 %v363_v1  ;;  %379 = vadd.xlane.f32.xlu0 %v359_v2 }
 0x234   :  { %377 = vadd.xlane.f32.xlu1 %v358_v3  ;;  %v403_v3 = vld [vmem:[%s862_s6] sm:$0xff] }
 0x23b   :  { %381 = vadd.xlane.f32.xlu2 %v360_v6  ;;  %373 = vadd.xlane.f32.xlu0 %v356_v7  ;;  %v406_v6 = vld [vmem:[%s862_s6 + $0x18] sm:$0xff]  ;;  %s482_s6 = sshll.u32 %s864_s8, 4  ;;  %s483_s6 = int_to_ptr.hbm [resolvable:$true] %s482_s6 }
 0x23c   :  { %371 = vadd.xlane.f32.xlu1 %v355_v8 }
 0x243   :  { %375 = vadd.xlane.f32.xlu2 %v357_v10 }
 0x28e   :  { %v402_v12 = vpop.xlane.xlu2 %401  ;;  %v400_v14 = vpop.xlane.xlu0 %399 }
 0x28f   :  { %v438_v15 = vmul.f32 %v422_v11, %v402_v12  ;;  %v398_v17 = vpop.xlane.xlu1 %397  ;;  %v437_v18 = vmul.f32 %v421_v13, %v400_v14 }
 0x290   :  { %v436_v19 = vmul.f32 %v420_v16, %v398_v17 }
 0x291   :  { %439 = vmatpush.msrb.mxu1 %v438_v15  ;;  %505 = vmatpush.msrb.mxu3 %v438_v15 }
 0x293   :  { %440 = vmatpush.msrb.mxu1 %v437_v18  ;;  %506 = vmatpush.msrb.mxu3 %v437_v18 }
 0x295   :  { %441 = vmatpush.msrb.mxu1 %v436_v19  ;;  %507 = vmatpush.msrb.mxu3 %v436_v19 }
 0x296   :  { %v396_v21 = vpop.xlane.xlu2 %395  ;;  %v392_v23 = vpop.xlane.xlu0 %391 }
 0x297   :  { %v435_v22 = vmul.f32 %v419_v20, %v396_v21  ;;  %v390_v24 = vpop.xlane.xlu1 %389  ;;  %v433_v30 = vmul.f32 %v417_v26, %v392_v23 }
 0x298   :  { %v432_v32 = vmul.f32 %v416_v29, %v390_v24 }
 0x299   :  { %442 = vmatpush.msrb.mxu1 %v435_v22  ;;  %508 = vmatpush.msrb.mxu3 %v435_v22 }
 0x29e   :  { %v394_v27 = vpop.xlane.xlu2 %393  ;;  %v386_v31 = vpop.xlane.xlu0 %385 }
 0x29f   :  { %v434_v28 = vmul.f32 %v418_v25, %v394_v27  ;;  %v384_v33 = vpop.xlane.xlu1 %383  ;;  %v430_v39 = vmul.f32 %v414_v35, %v386_v31 }
 0x2a0   :  { %v429_v40 = vmul.f32 %v413_v38, %v384_v33 }
 0x2a1   :  { %443 = vmatpush.msrb.mxu1 %v434_v28  ;;  %509 = vmatpush.msrb.mxu3 %v434_v28 }
 0x2a3   :  { %444 = vmatpush.msrb.mxu1 %v433_v30  ;;  %510 = vmatpush.msrb.mxu3 %v433_v30 }
 0x2a5   :  { %445 = vmatpush.msrb.mxu1 %v432_v32  ;;  %511 = vmatpush.msrb.mxu3 %v432_v32 }
 0x2a6   :  { %v388_v36 = vpop.xlane.xlu2 %387  ;;  %v380_v41 = vpop.xlane.xlu0 %379 }
 0x2a7   :  { %v431_v37 = vmul.f32 %v415_v34, %v388_v36  ;;  %v378_v44 = vpop.xlane.xlu1 %377  ;;  %v427_v50 = vmul.f32 %v411_v43, %v380_v41 }
 0x2a8   :  { %v426_v53 = vmul.f32 %v410_v47, %v378_v44 }
 0x2a9   :  { %446 = vmatpush.msrb.mxu1 %v431_v37  ;;  %512 = vmatpush.msrb.mxu3 %v431_v37 }
 0x2ab   :  { %447 = vmatpush.msrb.mxu1 %v430_v39  ;;  %513 = vmatpush.msrb.mxu3 %v430_v39 }
 0x2ad   :  { %448 = vmatpush.msrb.mxu1 %v429_v40  ;;  %514 = vmatpush.msrb.mxu3 %v429_v40 }
 0x2ae   :  { %v382_v45 = vpop.xlane.xlu2 %381  ;;  %v374_v60 = vpop.xlane.xlu0 %373 }
 0x2af   :  { %v428_v46 = vmul.f32 %v412_v42, %v382_v45  ;;  %v372_v0 = vpop.xlane.xlu1 %371  ;;  %v424_v1 = vmul.f32 %v408_v59, %v374_v60 }
 0x2b0   :  { %v423_v2 = vmul.f32 %v407_v63, %v372_v0 }
 0x2b1   :  { %449 = vmatpush.msrb.mxu1 %v428_v46  ;;  %515 = vmatpush.msrb.mxu3 %v428_v46 }
 0x2b3   :  { %450 = vmatpush.msrb.mxu1 %v427_v50  ;;  %516 = vmatpush.msrb.mxu3 %v427_v50 }
 0x2b5   :  { %451 = vmatpush.msrb.mxu1 %v426_v53  ;;  %517 = vmatpush.msrb.mxu3 %v426_v53 }
 0x2b6   :  { %v376_v61 = vpop.xlane.xlu2 %375 }
 0x2b7   :  { %v425_v62 = vmul.f32 %v409_v58, %v376_v61 }
 0x2b9   :  { %452 = vmatpush.msrb.mxu1 %v425_v62  ;;  %518 = vmatpush.msrb.mxu3 %v425_v62 }
 0x2bb   :  { %453 = vmatpush.msrb.mxu1 %v424_v1  ;;  %519 = vmatpush.msrb.mxu3 %v424_v1 }
 0x2bd   :  { %454 = vmatpush.msrb.mxu1 %v423_v2  ;;  %520 = vmatpush.msrb.mxu3 %v423_v2 }
 0x2be   :  { %455 = vmatmul.f32.vlgmr.msrb.gmra.mxu1 %v403_v3  ;;  %461 = vmatmul.f32.vlgmr.msrb.gmra.mxu3 %v405_v4 }
 0x2c6   :  { %458 = vmatmul.f32.gmra.mxu1 %v404_v5  ;;  %464 = vmatmul.f32.gmra.mxu3 %v406_v6 }
 0x33b   :  { %v456_v7 = vpop.f32.mrf.mxu1 }
 0x33c   :  { %v468_v9 = vmul.f32 %v456_v7, %v196_v57 }
 0x341   :  { %v462_v8 = vpop.f32.mrf.mxu3 }
 0x342   :  { %v470_v10 = vmul.f32 %v462_v8, %v198_v55 }
 0x343   :  { %v459_v12 = vpop.f32.mrf.mxu1 }
 0x344   :  { %v472_v11 = vadd.f32 %v470_v10, %v468_v9  ;;  %v469_v14 = vmul.f32 %v459_v12, %v197_v54 }
 0x346   :  { %474 = vst [vmem:[#allocation8] sm:$0xff] %v472_v11 }
 0x349   :  { %v465_v13 = vpop.f32.mrf.mxu3 }
 0x34a   :  { %v471_v51 = vmul.f32 %v465_v13, %v199_v56 }
 0x34c   :  { %v473_v57 = vadd.f32 %v471_v51, %v469_v14 }
 0x34e   :  { %475 = vst [vmem:[#allocation8 + $0x8] sm:$0xff] %v473_v57 }
 0x34f   :  { %488 = dma.vmem_to_hbm [thread:$0]  %s481_s19, 256, %s483_s6, [#allocation4], %s641_s15, %s641_s15, %s642_s16  }
 0x350   :  { %637 = dma.done.wait [#allocation4], 256  }
 0x351   :  { %638 = vsyncadd [#allocation4], 4294967040 }
 0x352   :  { %493 = vsyncpa [#allocation3], 1 }
 0x353   :  { %494 = vsyncpa [#allocation6], 1 }
 0x354   :  { %495 = vsyncpa [#allocation4], 1 }

</bundles_post_ra>
